<compile_context>
chip_gen: v7x
topology: tpu7x:2x2x1
jax: 0.10.0
libtpu: 0.0.40
codegen_flags: <defaults>
</compile_context>

<pallas_src>
import functools

import jax
import jax.numpy as jnp
from jax.experimental import pallas as pl
from jax.experimental.pallas import tpu as pltpu


def _vmem_limit_bytes(fraction=0.75):
    """VMEM budget derived from the generation (64 MiB v7x, 128 MiB v5e/v6e)."""
    cap = 64 * 1024 * 1024  # conservative fallback (v7x physical VMEM)
    try:
        cap = int(pltpu.get_tpu_info().vmem_capacity_bytes)
    except Exception:
        pass
    return int(cap * fraction)


def _pick_tile(n, tile):
    """Largest tile <= `tile` that divides n (falls back to the full extent)."""
    if n <= tile:
        return n
    t = tile
    while t >= 8:
        if n % t == 0:
            return t
        t //= 2
    # TODO(synk): mask ragged KV edges in-kernel instead of a full-extent fallback.
    return n


# ---------------------------------------------------------------------------
# Linear projection kernel: y = (x @ W + b) * scale, lane-dense blocks.
# ---------------------------------------------------------------------------
def _linear_kernel(x_ref, w_ref, b_ref, o_ref, *, scale):
    # x_ref: (1, TN, E), w_ref: (E, D), b_ref: (1, D), o_ref: (1, TN, D)
    y = jnp.dot(x_ref[0], w_ref[...], preferred_element_type=jnp.float32)
    y = y + b_ref[...]
    if scale != 1.0:
        y = y * scale
    o_ref[0] = y.astype(o_ref.dtype)


def _linear(x, w, b, *, scale=1.0, row_tile=512):
    B, N, E = x.shape
    D = w.shape[1]
    TN = _pick_tile(N, row_tile)
    n_tiles = N // TN

    grid_spec = pltpu.PrefetchScalarGridSpec(
        num_scalar_prefetch=0,
        grid=(B, n_tiles),
        in_specs=[
            pl.BlockSpec((1, TN, E), lambda bi, ti: (bi, ti, 0)),
            pl.BlockSpec((E, D), lambda bi, ti: (0, 0)),   # resident weight
            pl.BlockSpec((1, D), lambda bi, ti: (0, 0)),   # resident bias
        ],
        out_specs=pl.BlockSpec((1, TN, D), lambda bi, ti: (bi, ti, 0)),
    )

    isz = jnp.dtype(x.dtype).itemsize
    cost = pl.CostEstimate(
        flops=int(2 * B * N * E * D),
        transcendentals=0,
        bytes_accessed=int((x.size + B * N * D) * isz
                           + w.size * jnp.dtype(w.dtype).itemsize
                           + b.size * jnp.dtype(b.dtype).itemsize))

    return pl.pallas_call(
        functools.partial(_linear_kernel, scale=float(scale)),
        out_shape=jax.ShapeDtypeStruct((B, N, D), x.dtype),
        grid_spec=grid_spec,
        compiler_params=pltpu.CompilerParams(
            dimension_semantics=("parallel", "parallel"),
            vmem_limit_bytes=_vmem_limit_bytes()),
        cost_estimate=cost,
    )(x, w, b)


# ---------------------------------------------------------------------------
# Head-batched attention kernel with online softmax over KV tiles and a fused
# lane-dense out_proj.  Grid = (B, q_tiles, kv_tiles).
# ---------------------------------------------------------------------------
def _attention_kernel(q_ref, k_ref, v_ref, wo_ref, bo_ref, o_ref,
                      m_ref, l_ref, acc_ref):
    # q_ref: (1, H, TQ, hd)   k_ref/v_ref: (1, H, TK, hd)
    # wo_ref: (H, hd, E)      bo_ref: (1, E)      o_ref: (1, TQ, E)
    # scratch: m_ref/l_ref (H, TQ, 1) f32, acc_ref (H, TQ, hd) f32
    ki = pl.program_id(2)

    @pl.when(ki == 0)
    def _():
        m_ref[...] = jnp.full(m_ref.shape, -jnp.inf, m_ref.dtype)
        l_ref[...] = jnp.zeros(l_ref.shape, l_ref.dtype)
        acc_ref[...] = jnp.zeros(acc_ref.shape, acc_ref.dtype)

    qh = q_ref[0]            # (H, TQ, hd), scale already folded into the projection
    kh = k_ref[0]            # (H, TK, hd)
    vh = v_ref[0]            # (H, TK, hd)

    # Head-batched QK^T: contract head_dim on both operands (no K transpose).
    s = jnp.einsum("hqc,hkc->hqk", qh, kh,
                   preferred_element_type=jnp.float32)          # (H, TQ, TK)

    m_prev = m_ref[...]                                         # (H, TQ, 1)
    m_new = jnp.maximum(m_prev, jnp.max(s, axis=-1, keepdims=True))
    alpha = jnp.exp(m_prev - m_new)
    p = jnp.exp(s - m_new)                                      # (H, TQ, TK)
    l_ref[...] = alpha * l_ref[...] + jnp.sum(p, axis=-1, keepdims=True)
    pv = jnp.einsum("hqk,hkc->hqc", p.astype(vh.dtype), vh,
                    preferred_element_type=jnp.float32)         # (H, TQ, hd)
    acc_ref[...] = alpha * acc_ref[...] + pv
    m_ref[...] = m_new

    @pl.when(ki == pl.num_programs(2) - 1)
    def _():
        # Deferred softmax normalization: O(TQ*hd) per head, exact reciprocal.
        acc_n = acc_ref[...] * pl.reciprocal(l_ref[...], approx=False)
        acc_n = acc_n.astype(qh.dtype)
        # Fused out_proj: per-head matmul against wo[h*hd:(h+1)*hd, :] then a
        # leading-axis sum -> lane-dense (TQ, E) output, no in-kernel transpose.
        out_h = jnp.einsum("hqc,hce->hqe", acc_n, wo_ref[...],
                           preferred_element_type=jnp.float32)  # (H, TQ, E)
        out = jnp.sum(out_h, axis=0) + bo_ref[...]
        o_ref[0] = out.astype(o_ref.dtype)


def attention_forward(q, k, v, params, num_heads, *, q_tile=256, kv_tile=512,
                      row_tile=512, compute_dtype=jnp.bfloat16):
    """q: (B, Nq, E); k, v: (B, Nk, E). Returns (B, Nq, E) in q.dtype."""
    B, Nq, E = q.shape
    _, Nk, _ = k.shape
    D = params["wq"].shape[1]                 # internal_dim
    assert D % num_heads == 0, "num_heads must divide internal_dim"
    hd = D // num_heads
    scale = hd ** (-0.5)
    out_dtype = q.dtype
    cd = compute_dtype

    cparams = {name: w.astype(cd) for name, w in params.items()}

    # 1) Projections, computed once (not per query tile); scale folded into q.
    qp = _linear(q.astype(cd), cparams["wq"], cparams["bq"], scale=scale,
                 row_tile=row_tile)
    kp = _linear(k.astype(cd), cparams["wk"], cparams["bk"], row_tile=row_tile)
    vp = _linear(v.astype(cd), cparams["wv"], cparams["bv"], row_tile=row_tile)

    # 2) Head separation as wrapper-side layout plumbing (XLA reshape+transpose)
    #    so the kernel only does leading-batch matmuls, never lane slicing.
    def split_heads(x):
        return x.reshape(B, -1, num_heads, hd).transpose(0, 2, 1, 3)

    qph, kph, vph = split_heads(qp), split_heads(kp), split_heads(vp)
    wo_h = cparams["wo"].reshape(num_heads, hd, E)   # row h*hd+c -> [h, c, :]
    bo = cparams["bo"]

    TQ = _pick_tile(Nq, q_tile)
    TK = _pick_tile(Nk, kv_tile)
    nq_t = Nq // TQ
    nk_t = Nk // TK

    grid_spec = pltpu.PrefetchScalarGridSpec(
        num_scalar_prefetch=0,
        grid=(B, nq_t, nk_t),
        in_specs=[
            pl.BlockSpec((1, num_heads, TQ, hd), lambda b, qi, ki: (b, 0, qi, 0)),
            pl.BlockSpec((1, num_heads, TK, hd), lambda b, qi, ki: (b, 0, ki, 0)),
            pl.BlockSpec((1, num_heads, TK, hd), lambda b, qi, ki: (b, 0, ki, 0)),
            pl.BlockSpec((num_heads, hd, E), lambda b, qi, ki: (0, 0, 0)),
            pl.BlockSpec((1, E), lambda b, qi, ki: (0, 0)),
        ],
        out_specs=pl.BlockSpec((1, TQ, E), lambda b, qi, ki: (b, qi, 0)),
        scratch_shapes=[
            pltpu.VMEM((num_heads, TQ, 1), jnp.float32),    # running max
            pltpu.VMEM((num_heads, TQ, 1), jnp.float32),    # running denom
            pltpu.VMEM((num_heads, TQ, hd), jnp.float32),   # output accumulator
        ],
    )

    isz = jnp.dtype(cd).itemsize
    flops = (2 * B * num_heads * Nq * Nk * hd * 2       # QK^T + PV
             + 2 * B * Nq * D * E)                       # fused out_proj
    bytes_accessed = (qph.size * isz
                      + nq_t * (kph.size + vph.size) * isz   # K/V re-fetched per q tile
                      + B * Nq * E * jnp.dtype(out_dtype).itemsize
                      + wo_h.size * isz + bo.size * isz)
    cost = pl.CostEstimate(flops=int(flops),
                           transcendentals=int(B * num_heads * Nq * (Nk + nk_t)),
                           bytes_accessed=int(bytes_accessed))

    return pl.pallas_call(
        _attention_kernel,
        out_shape=jax.ShapeDtypeStruct((B, Nq, E), out_dtype),
        grid_spec=grid_spec,
        compiler_params=pltpu.CompilerParams(
            dimension_semantics=("parallel", "parallel", "arbitrary"),
            vmem_limit_bytes=_vmem_limit_bytes()),
        cost_estimate=cost,
    )(qph, kph, vph, wo_h, bo)


# ---------------------------------------------------------------------------
# Pure-JAX f32 reference mirroring the PyTorch forward.
# ---------------------------------------------------------------------------
def attention_reference(q, k, v, params, num_heads):
    hp = jax.lax.Precision.HIGHEST
    qp = jnp.einsum("bne,ed->bnd", q, params["wq"], precision=hp) + params["bq"]
    kp = jnp.einsum("bne,ed->bnd", k, params["wk"], precision=hp) + params["bk"]
    vp = jnp.einsum("bne,ed->bnd", v, params["wv"], precision=hp) + params["bv"]
    B, Nq, D = qp.shape
    Nk = kp.shape[1]
    hd = D // num_heads
    qh = qp.reshape(B, Nq, num_heads, hd)
    kh = kp.reshape(B, Nk, num_heads, hd)
    vh = vp.reshape(B, Nk, num_heads, hd)
    s = jnp.einsum("bqhc,bkhc->bhqk", qh, kh, precision=hp) * (hd ** -0.5)
    p = jax.nn.softmax(s, axis=-1)
    o = jnp.einsum("bhqk,bkhc->bqhc", p, vh, precision=hp).reshape(B, Nq, D)
    return jnp.einsum("bnd,de->bne", o, params["wo"], precision=hp) + params["bo"]


def init_params(key, embedding_dim, internal_dim):
    """Deterministic synthetic init (PyTorch Linear shapes, stored transposed)."""
    keys = jax.random.split(key, 8)
    s = 0.1
    return {
        "wq": s * jax.random.normal(keys[0], (embedding_dim, internal_dim), jnp.float32),
        "bq": s * jax.random.normal(keys[1], (1, internal_dim), jnp.float32),
        "wk": s * jax.random.normal(keys[2], (embedding_dim, internal_dim), jnp.float32),
        "bk": s * jax.random.normal(keys[3], (1, internal_dim), jnp.float32),
        "wv": s * jax.random.normal(keys[4], (embedding_dim, internal_dim), jnp.float32),
        "bv": s * jax.random.normal(keys[5], (1, internal_dim), jnp.float32),
        "wo": s * jax.random.normal(keys[6], (internal_dim, embedding_dim), jnp.float32),
        "bo": s * jax.random.normal(keys[7], (1, embedding_dim), jnp.float32),
    }


if __name__ == "__main__":
    # SegVol-like but small: embedding_dim=256, num_heads=8, downsample_rate=2
    # -> internal_dim=128, head_dim=16. E and D are lane-dense multiples of 128.
    B, Nq, Nk = 2, 8, 32
    E, H, downsample_rate = 256, 8, 2
    D = E // downsample_rate

    key = jax.random.PRNGKey(0)
    k_in, k_params = jax.random.split(key)
    kq, kk, kv = jax.random.split(k_in, 3)
    q = jax.random.normal(kq, (B, Nq, E), jnp.float32)
    k = jax.random.normal(kk, (B, Nk, E), jnp.float32)
    v = jax.random.normal(kv, (B, Nk, E), jnp.float32)
    params = init_params(k_params, E, D)

    # Default path: bf16 MXU operands, f32 accumulation.
    out = jax.block_until_ready(attention_forward(q, k, v, params, H))
    assert out.shape == (B, Nq, E), out.shape

    ref = attention_reference(q, k, v, params, H)
    rel_l2 = float(jnp.linalg.norm(out.astype(jnp.float32) - ref)
                   / jnp.linalg.norm(ref))
    # Tolerance covers bf16 operand rounding; structural bugs give O(1) error.
    assert rel_l2 < 5e-2, f"mismatch vs reference: rel_l2={rel_l2}"

    print("KERNEL_OK")
</pallas_src>

<mosaic_0001>
module attributes {stable_mosaic.version = 11 : i64} {
  func.func @_linear_kernel(%arg0: i32, %arg1: i32, %arg2: memref<1x8x256xbf16, #tpu.memory_space<vmem>>, %arg3: memref<256x128xbf16, #tpu.memory_space<vmem>>, %arg4: memref<1x128xbf16, #tpu.memory_space<vmem>>, %arg5: memref<1x8x128xbf16, #tpu.memory_space<vmem>>) attributes {dimension_semantics = [#tpu.dimension_semantics<parallel>, #tpu.dimension_semantics<parallel>], iteration_bounds = array<i64: 2, 1>, scalar_prefetch = 0 : i64, scratch_operands = 0 : i64, tpu.core_type = #tpu.core_type<tc>, window_params = [{transform_indices = @transform_0, window_bounds = array<i64: 1, 8, 256>}, {pipeline_mode = #tpu.pipeline_mode<synchronous>, transform_indices = @transform_1, window_bounds = array<i64: 256, 128>}, {pipeline_mode = #tpu.pipeline_mode<synchronous>, transform_indices = @transform_2, window_bounds = array<i64: 1, 128>}, {transform_indices = @transform_3, window_bounds = array<i64: 1, 8, 128>}]} {
    %c0 = arith.constant 0 : index
    %c0_0 = arith.constant 0 : index
    %c0_1 = arith.constant 0 : index
    %0 = vector.load %arg2[%c0, %c0_0, %c0_1] : memref<1x8x256xbf16, #tpu.memory_space<vmem>>, vector<1x8x256xbf16>
    %1 = vector.shape_cast %0 : vector<1x8x256xbf16> to vector<8x256xbf16>
    %c0_2 = arith.constant 0 : index
    %c0_3 = arith.constant 0 : index
    %2 = vector.load %arg3[%c0_2, %c0_3] : memref<256x128xbf16, #tpu.memory_space<vmem>>, vector<256x128xbf16>
    %cst = arith.constant dense<0.000000e+00> : vector<8x128xf32>
    %3 = tpu.matmul %1, %2, %cst {dimension_numbers = #tpu.dot_dimension_numbers<[1], [0], [0], [1], [0, 0, 1, 1], [], []>} : vector<8x256xbf16>, vector<256x128xbf16>, vector<8x128xf32> -> vector<8x128xf32>
    %c0_4 = arith.constant 0 : index
    %c0_5 = arith.constant 0 : index
    %4 = vector.load %arg4[%c0_4, %c0_5] : memref<1x128xbf16, #tpu.memory_space<vmem>>, vector<1x128xbf16>
    %5 = arith.extf %4 : vector<1x128xbf16> to vector<1x128xf32>
    %6 = vector.broadcast %5 : vector<1x128xf32> to vector<8x128xf32>
    %7 = arith.addf %3, %6 : vector<8x128xf32>
    %cst_6 = arith.constant 2.500000e-01 : f32
    %8 = vector.broadcast %cst_6 : f32 to vector<8x128xf32>
    %9 = arith.mulf %7, %8 : vector<8x128xf32>
    %10 = arith.truncf %9 : vector<8x128xf32> to vector<8x128xbf16>
    %c0_7 = arith.constant 0 : index
    %c0_8 = arith.constant 0 : index
    %c0_9 = arith.constant 0 : index
    %11 = vector.load %arg5[%c0_7, %c0_8, %c0_9] : memref<1x8x128xbf16, #tpu.memory_space<vmem>>, vector<1x8x128xbf16>
    %12 = vector.shape_cast %11 : vector<1x8x128xbf16> to vector<8x128xbf16>
    %13 = vector.shape_cast %10 : vector<8x128xbf16> to vector<1x8x128xbf16>
    tpu.vector_store %arg5[%c0_7, %c0_8, %c0_9], %13 {strides = array<i32>} : memref<1x8x128xbf16, #tpu.memory_space<vmem>>, vector<1x8x128xbf16>,
    return
  }
  func.func @transform_0(%arg0: i32, %arg1: i32) -> (i32, i32, i32) {
    %c0_i32 = arith.constant 0 : i32
    %c0_i32_0 = arith.constant 0 : i32
    return %arg0, %arg1, %c0_i32 : i32, i32, i32
  }
  func.func @transform_1(%arg0: i32, %arg1: i32) -> (i32, i32) {
    %c0_i32 = arith.constant 0 : i32
    %c0_i32_0 = arith.constant 0 : i32
    %c0_i32_1 = arith.constant 0 : i32
    return %c0_i32, %c0_i32_0 : i32, i32
  }
  func.func @transform_2(%arg0: i32, %arg1: i32) -> (i32, i32) {
    %c0_i32 = arith.constant 0 : i32
    %c0_i32_0 = arith.constant 0 : i32
    %c0_i32_1 = arith.constant 0 : i32
    return %c0_i32, %c0_i32_0 : i32, i32
  }
  func.func @transform_3(%arg0: i32, %arg1: i32) -> (i32, i32, i32) {
    %c0_i32 = arith.constant 0 : i32
    %c0_i32_0 = arith.constant 0 : i32
    return %arg0, %arg1, %c0_i32 : i32, i32, i32
  }
}

</mosaic_0001>

<bundles_post_ra>
// kernel: tpu_custom_call.1
= control target key start
LH: loop header
LB: loop body
LE: loop exit
PB: predicated region body
PF: predicated region fallthrough
CT: control target
= control target key end

     0   :  { %8 = vsyncpa [#allocation3], 0  ;;  %s1052_s0 = inlined_call_operand.hbm [shape: bf16[2,8,256], index: 0, kind: input, shape index: {}]   ;;  %s1053_s1 = inlined_call_operand.hbm [shape: bf16[256,128], index: 1, kind: input, shape index: {}]   ;;  %s1054_s2 = inlined_call_operand.vmem [shape: bf16[1,128], index: 2, kind: input, shape index: {}]   ;;  %s1055_s3 = inlined_call_operand.hbm [shape: bf16[2,8,128], index: 3, kind: output, shape index: {}]  }
   0x1   :  { %10 = vsyncpa [#allocation3 + $0x1], 0 }
   0x2   :  { %11 = vsyncpa [#allocation6], 0 }
   0x3   :  { %12 = vsyncpa [#allocation4], 0 }
   0x4   :  { %14 = vsyncpa [#allocation4 + $0x1], 0  ;;  %s834_s12 = smov 0   ;;  %s836_s13 = smov 0  }
   0x5   :  { %s838_s14 = smov 0   ;;  %s840_s15 = smov 0  }
   0x6   :  { %s842_s16 = smov 0   ;;  %s844_s17 = smov 0  }
   0x7 LB: > { %s513_s18 = sadd.s32 4294967295, %s807_s17   ;;  %s514_s19 = sadd.s32 4294967294, %s807_s17   ;;  %s807_s17 = sphi %s844_s17, %s20_s17   ;;  %s803_s16 = sphi %s842_s16, %s1079_s16   ;;  %s799_s15 = sphi %s840_s15, %s1078_s15   ;;  %s795_s14 = sphi %s838_s14, %s1077_s14   ;;  %s791_s13 = sphi %s836_s13, %s1076_s13   ;;  %s787_s12 = sphi %s834_s12, %s1075_s12  }
   0x8   : > { %p54_p0 = scmp.ne.s32.totalorder %s791_s13, %s787_s12  ;;  %p868_p1 = scmp.eq.s32.totalorder %s513_s18, 0 }
   0x9   : > { %p872_p2 = scmp.eq.s32.totalorder %s513_s18, 1  ;;  %p128_p3 = scmp.eq.s32.totalorder %s514_s19, 1 }
   0xa   : > { %s1060_s20 = scalar_select %p868_p1, 1, 0 }
   0xb   : > { %s1061_s21 = scalar_select %p872_p2, 1, 0 }
   0xc   : > { %p878_p4 = por %p868_p1, %p54_p0  ;;  %p515_p5 = scmp.ge.s32.totalorder %s807_s17, 1 }
   0xd   : > { %p883_p6 = por %p128_p3, %p54_p0  ;;  %p135_p7 = scmp.lt.s32.totalorder %s807_s17, 3 }
   0xe   : > { %s1062_s22 = scalar_select %p878_p4, 1, 0 }
   0xf   : > { %s1063_s23 = scalar_select %p883_p6, 1, 0 }
  0x10   : > { %p888_p8 = pnand %p515_p5, %p135_p7  ;;  %s809_s25 = smov [#allocation5]  }
  0x11   : > { %s147_s26 = sshll.u32 %s809_s25, 4  ;;  %s32_s28 = sadd.s32 1, %s803_s16  ;;  %s148_s26 = int_to_ptr.vmem [resolvable:$true] %s147_s26 }
  0x12   : > { %s1064_s24 = scalar_select %p888_p8, 1, 0 }
  0x13   : > { %p578_p9 = pneg %p888_p8  ;;  %s663_s4 = scalar_lea.hbm %s1053_s1, 2048 }
  0x14   : > { %p664_p12 = scmp.ne.s32.totalorder %s1053_s1, %s663_s4  ;;  %p670_p5 = scmp.lt.u32.totalorder %s663_s4, %s1053_s1 }
  0x15   : > { %p897_p11 = pnand %p578_p9, %p868_p1 }
  0x17   : > { %p665_p13 = pneg %p897_p11 }
  0x19   : > { %p666_p0 = pnand %p665_p13, %p664_p12 }
  0x1b   : > { %p667_p3 = pneg %p666_p0 }
  0x1d   : > { %p672_p7 = pnand %p670_p5, %p667_p3 }
  0x1f   : > { %675 = shalt.err (!%p672_p7)
}
  0x20   : > { %s676_s9 = scalar_lea.vmem %s148_s26, 2048  ;;  %p684_p1 = scmp.lt.s32.totalorder %s148_s26, %s148_s26 }
  0x21   : > { %p677_p9 = scmp.ne.s32.totalorder %s148_s26, %s676_s9  ;;  %p685_p4 = scmp.lt.s32.totalorder %s676_s9, %s676_s9 }
  0x23   : > { %p679_p10 = pnand %p677_p9, %p665_p13  ;;  %p686_p8 = por %p685_p4, %p684_p1 }
  0x25   : > { %p680_p6 = pneg %p679_p10 }
  0x27   : > { %p687_p2 = pnand %p686_p8, %p680_p6 }
  0x29   : > { %690 = shalt.err (!%p687_p2)
}
  0x2a   : > { %s810_s10 = smov 64   ;;  %s811_s11 = smov 4  }
  0x2b   : > { %581 = dma.hbm_to_vmem [thread:$0]  (!%p897_p11), %s1053_s1, 2048, %s148_s26, [#allocation6], %s810_s10, %s810_s10, %s811_s11  }
  0x2c   : > { %p34_p1 = scmp.ge.s32.totalorder %s32_s28, 2  ;;  %s41_s25 = sadd.s32 1, %s795_s14 }
  0x2d   : > { %p48_p2 = scmp.ne.s32.totalorder %s795_s14, %s791_s13  ;;  %p49_p4 = scmp.eq.s32.totalorder %s807_s17, 0 }
  0x2e   : > { %s1081_s28 = smov (%p34_p1, %s32_s28), 0  ;;  %p1067_p8 = scmp.ne.s32.totalorder %s1061_s21, 0 }
  0x2f   : > { %p924_p6 = por %p49_p4, %p48_p2  ;;  %s36_s27 = ssub.s32 %s803_s16, %s1081_s28 }
  0x30   : > { %p930_p10 = por %p1067_p8, %p48_p2  ;;  %p591_p12 = scmp.lt.s32.totalorder %s807_s17, 2 }
  0x31   : > { %p39_p11 = scmp.eq.s32.totalorder %s36_s27, 0  ;;  %s164_s26 = sand.u32 1, %s795_s14  }
  0x32   : > { %s518_s4 = sshll.u32 %s164_s26, 3  ;;  %s547_s6 = sshll.u32 %s803_s16, 7 }
  0x33   : > { %s939_s5 = scalar_select %p39_p11, %s795_s14, %s41_s25  }
  0x34   : > { %s945_s9 = scalar_lea.hbm %s1052_s0, %s547_s6  ;;  %s168_s21 = scalar_lea.vmem [#allocation2], %s518_s4 }
  0x35   : > { %s178_s10 = sshll.u32 %s168_s21, 4  ;;  %p951_p13 = pnand %p591_p12, %p924_p6  ;;  %s947_s10 = int_to_ptr.vmem [resolvable:$true] %s178_s10 }
  0x36   : > { %s165_s18 = scalar_lea.sflag [#allocation3], %s164_s26  ;;  %s691_s19 = scalar_lea.hbm %s945_s9, 128 }
  0x37   : > { %p692_p0 = scmp.ne.s32.totalorder %s945_s9, %s691_s19  ;;  %p693_p3 = pneg %p951_p13 }
  0x38   : > { %s696_s4 = scalar_lea.hbm %s1052_s0, 256  ;;  %p697_p9 = scmp.lt.u32.totalorder %s945_s9, %s1052_s0 }
  0x39   : > { %p694_p5 = pnand %p693_p3, %p692_p0  ;;  %p698_p1 = scmp.lt.u32.totalorder %s696_s4, %s691_s19 }
  0x3a   : > { %p700_p4 = scmp.lt.u32.totalorder %s691_s19, %s945_s9 }
  0x3b   : > { %p695_p7 = pneg %p694_p5  ;;  %p699_p2 = por %p698_p1, %p697_p9 }
  0x3d   : > { %p701_p6 = por %p700_p4, %p699_p2 }
  0x3f   : > { %p702_p8 = pnand %p701_p6, %p695_p7 }
  0x41   : > { %705 = shalt.err (!%p702_p8)
}
  0x42   : > { %s706_s26 = scalar_lea.vmem %s947_s10, 128  ;;  %s812_s7 = smov [#allocation2]  }
  0x43   : > { %p707_p12 = scmp.ne.s32.totalorder %s947_s10, %s706_s26  ;;  %s711_s8 = sshll.u32 %s812_s7, 4  ;;  %s712_s8 = int_to_ptr.vmem [resolvable:$false] %s711_s8 }
  0x44   : > { %s713_s21 = scalar_lea.vmem %s712_s8, 256  ;;  %p714_p5 = scmp.lt.s32.totalorder %s947_s10, %s712_s8 }
  0x45   : > { %p709_p11 = pnand %p707_p12, %p693_p3  ;;  %p715_p9 = scmp.lt.s32.totalorder %s713_s21, %s706_s26 }
  0x47   : > { %p710_p0 = pneg %p709_p11  ;;  %p716_p1 = por %p715_p9, %p714_p5 }
  0x49   : > { %p717_p2 = pnand %p716_p1, %p710_p0 }
  0x4b   : > { %720 = shalt.err (!%p717_p2)
}
  0x4c   : > { %585 = dma.hbm_to_vmem [thread:$0]  (!%p951_p13), %s945_s9, 128, %s947_s10, %s165_s18  }
  0x4d   : > { %p1070_p7 = scmp.ne.s32.totalorder %s1064_s24, 0 }
  0x4e   : > { %s983_s19 = sand.u32 (!%p1070_p7), 1, %s791_s13   ;;  %p1071_p3 = scmp.ne.s32.totalorder (!%p1070_p7), %s1062_s22, 0 }
  0x4f   : > { %187 = sbr.rel (%p1070_p7) target bundleno = 358 (0x166), region = 32  ;;  %s522_s25 = sshll.u32 (!%p1070_p7), %s983_s19, 3 }
  0x50   : > { %s190_s27 = scalar_lea.sflag (!%p1070_p7), [#allocation3], %s983_s19  ;;  %s193_s4 = scalar_lea.vmem (!%p1070_p7), [#allocation2], %s522_s25 }
  0x56   : > { %774 = dma.done.wait (%p1071_p3), %s190_s27, 128  }
  0x57   : > { %776 = vsyncadd (%p1071_p3), %s190_s27, 4294967168  ;;  %p1072_p4 = scmp.ne.s32.totalorder %s1060_s20, 0 }
  0x59   : > { %778 = dma.done.wait (%p1072_p4), [#allocation6], 2048  }
  0x5a   : > { %780 = vsyncadd (%p1072_p4), [#allocation6], 4294965248  ;;  %v645_v0 = vld [vmem:[#allocation5 + $0x40] sm:$0xff]   ;;  %v647_v2 = vld [vmem:[#allocation5 + $0x48] sm:$0xff]   ;;  %v256_v19 = vlaneseq  ;;  %s524_s24 = sshll.u32 %s983_s19, 2  ;;  %s544_s9 = sshll.u32 %s799_s15, 6 }
  0x5b   : > { %v646_v1 = vld [vmem:[#allocation5] sm:$0xff]   ;;  %548 = vmatprep.subr.bf16.mxu0 %v645_v0  ;;  %v648_v3 = vld [vmem:[#allocation5 + $0x8] sm:$0xff]   ;;  %v649_v4 = vld [vmem:[#allocation5 + $0x50] sm:$0xff]   ;;  %s219_s10 = scalar_lea.vmem [#allocation7], %s524_s24  ;;  %s1003_s6 = scalar_lea.hbm %s1055_s3, %s544_s9 }
  0x5c   : > { %549 = vmatpush3.bf16.msra.mxu0 %v646_v1  ;;  %v650_v5 = vld [vmem:[#allocation5 + $0x10] sm:$0xff]   ;;  %v651_v6 = vld [vmem:[#allocation5 + $0x58] sm:$0xff]   ;;  %v653_v8 = vld [vmem:[#allocation5 + $0x60] sm:$0xff]   ;;  %v257_v20 = vshrl.u32 %v256_v19, 7  ;;  %s421_s11 = sshll.u32 %s219_s10, 4  ;;  %s407_s26 = scalar_lea.sflag [#allocation4], %s983_s19  ;;  %s1005_s11 = int_to_ptr.vmem [resolvable:$true] %s421_s11 }
  0x5d   : > { %550 = vmatprep.subr.bf16.mxu0 %v647_v2  ;;  %v652_v7 = vld [vmem:[#allocation5 + $0x18] sm:$0xff]   ;;  %v654_v9 = vld [vmem:[#allocation5 + $0x20] sm:$0xff]   ;;  %v655_v10 = vld [vmem:[#allocation5 + $0x68] sm:$0xff]   ;;  %s721_s7 = scalar_lea.vmem %s1005_s11, 64  ;;  %s813_s15 = smov [#allocation7]  }
  0x5e   : > { %v221_v11 = vld [vmem:[%s193_s4] sm:$0xff]  ;;  %v656_v13 = vld [vmem:[#allocation5 + $0x28] sm:$0xff]   ;;  %v258_v23 = vsub.s32 0, %v257_v20  ;;  %p722_p13 = scmp.ne.s32.totalorder %s1005_s11, %s721_s7  ;;  %s725_s8 = sshll.u32 %s813_s15, 4  ;;  %s726_s8 = int_to_ptr.vmem [resolvable:$false] %s725_s8 }
  0x5f   : > { %v526_v12 = vcombine.high %v221_v11, %v221_v11  ;;  %v657_v14 = vld [vmem:[#allocation5 + $0x70] sm:$0xff]   ;;  %v659_v16 = vld [vmem:[#allocation5 + $0x78] sm:$0xff]   ;;  %v525_v18 = vcombine.low %v221_v11, %v221_v11  ;;  %s727_s21 = scalar_lea.vmem %s726_s8, 128  ;;  %p728_p12 = scmp.lt.s32.totalorder %s1005_s11, %s726_s8 }
  0x60   : > { %551 = vmatpush3.bf16.msra.mxu0 %v648_v3  ;;  %v658_v15 = vld [vmem:[#allocation5 + $0x30] sm:$0xff]   ;;  %v660_v17 = vld [vmem:[#allocation5 + $0x38] sm:$0xff]   ;;  %p723_p6 = pnand %p722_p13, %p930_p10  ;;  %p729_p11 = scmp.lt.s32.totalorder %s727_s21, %s721_s7 }
  0x61   : > { %552 = vmatprep.subr.bf16.mxu0 %v649_v4  ;;  %395 = vmatprep.mubr.bf16.mxu0 %v526_v12  ;;  %v254_v21 = vld [vmem:[%s1054_s2] sm:$0x1] }
  0x62   : > { %v255_v22 = vunpack.c.l.bf16 %v254_v21  ;;  %p724_p8 = pneg %p723_p6  ;;  %p730_p0 = por %p729_p11, %p728_p12 }
  0x64   : > { %553 = vmatpush3.bf16.msra.mxu0 %v650_v5  ;;  %v259_v25 = vrot.slane %v255_v22, %v258_v23  ;;  %p731_p5 = pnand %p730_p0, %p724_p8 }
  0x65   : > { %554 = vmatprep.subr.bf16.mxu0 %v651_v6 }
  0x68   : > { %555 = vmatpush3.bf16.msra.mxu0 %v652_v7 }
  0x69   : > { %556 = vmatprep.subr.bf16.mxu0 %v653_v8 }
  0x6c   : > { %557 = vmatpush3.bf16.msra.mxu0 %v654_v9 }
  0x6d   : > { %558 = vmatprep.subr.bf16.mxu0 %v655_v10 }
  0x70   : > { %559 = vmatpush3.bf16.msra.mxu0 %v656_v13 }
  0x71   : > { %560 = vmatprep.subr.bf16.mxu0 %v657_v14 }
  0x74   : > { %561 = vmatpush3.bf16.msra.mxu0 %v658_v15 }
  0x75   : > { %562 = vmatprep.subr.bf16.mxu0 %v659_v16 }
  0x78   : > { %563 = vmatpush3.bf16.msra.mxu0 %v660_v17 }
  0x7b   : > { %396 = vmatmul.mubr.bf16.vlgmr.msra.gmra.mrb[0].mxu0 %v525_v18 }
 0x14e   : > { %v564_v24 = vpop.f32.mrb[0].mxu0 }
 0x14f   : > { %v565_v26 = vpop.f32.mrb[1].mxu0 }
 0x150   : > { %v566_v27 = vadd.f32 %v565_v26, %v564_v24  ;;  %v567_v28 = vpop.f32.mrb[2].mxu0 }
 0x151   : > { %v568_v29 = vpop.f32.mrb[3].mxu0 }
 0x152   : > { %v398_v30 = vadd.f32 %v566_v27, %v259_v25 }
 0x154   : > { %v403_v31 = vmul.f32 0.25, %v398_v30 }
 0x156   : > { %v404_v32 = vpack.c.bf16 %v403_v31, %v403_v31 }
 0x158   : > { %405 = vst [vmem:[%s219_s10] sm:$0xf] %v404_v32 }
 0x159   : > { %734 = shalt.err (!%p731_p5)
}
 0x15a   : > { %s735_s19 = scalar_lea.hbm %s1003_s6, 64  ;;  %s739_s4 = scalar_lea.hbm %s1055_s3, 128 }
 0x15b   : > { %p736_p9 = scmp.ne.s32.totalorder %s1003_s6, %s735_s19  ;;  %p740_p7 = scmp.lt.u32.totalorder %s1003_s6, %s1055_s3 }
 0x15c   : > { %p741_p3 = scmp.lt.u32.totalorder %s739_s4, %s735_s19  ;;  %p743_p13 = scmp.lt.u32.totalorder %s735_s19, %s1003_s6 }
 0x15d   : > { %p737_p1 = pnand %p736_p9, %p930_p10 }
 0x15e   : > { %p742_p4 = por %p741_p3, %p740_p7 }
 0x15f   : > { %p738_p2 = pneg %p737_p1 }
 0x160   : > { %p744_p6 = por %p743_p13, %p742_p4 }
 0x162   : > { %p745_p8 = pnand %p744_p6, %p738_p2 }
 0x164   : > { %748 = shalt.err (!%p745_p8)
}
 0x165   : > { %576 = dma.vmem_to_hbm [thread:$0]  (%p930_p10), %s1005_s11, 64, %s1003_s6, %s407_s26  }
 0x166 PF: > { %s433_s24 = sand.u32 1, %s787_s12   ;;  %p1073_p12 = scmp.ne.s32.totalorder %s1063_s23, 0 }
 0x167   : > { %p1074_p11 = scmp.ge.s32.totalorder %s807_s17, 2  ;;  %s434_s9 = scalar_lea.sflag [#allocation4], %s433_s24 }
 0x169   : > { %p587_p0 = pnand %p1074_p11, %p1073_p12 }
 0x16b   : > { %782 = dma.done.wait (!%p587_p0), %s434_s9, 64  }
 0x16c   : > { %784 = vsyncadd (!%p587_p0), %s434_s9, 4294967232  ;;  %s20_s17 = sadd.s32 1, %s807_s17   ;;  %s1075_s12 = smov %s791_s13 }
 0x16d   : > { %p17_p5 = scmp.ge.s32.totalorder %s20_s17, 4   ;;  %s1076_s13 = smov %s795_s14 }
 0x16e   : > { %s1077_s14 = smov %s939_s5  ;;  %s1078_s15 = smov %s803_s16 }
 0x16f   : > { %s1079_s16 = smov %s1081_s28  ;;  %19 = sbr.rel (!%p17_p5) target bundleno = 7 (0x7), region = 81 }
 0x176   :  { %439 = vsyncpa [#allocation3], 1 }
 0x177   :  { %441 = vsyncpa [#allocation3 + $0x1], 1 }
 0x178   :  { %442 = vsyncpa [#allocation6], 1 }
 0x179   :  { %443 = vsyncpa [#allocation4], 1 }
 0x17a   :  { %445 = vsyncpa [#allocation4 + $0x1], 1 }

</bundles_post_ra>
